<compile_context>
chip_gen: v7x
topology: tpu7x:2x2x1
jax: 0.10.0
libtpu: 0.0.40
codegen_flags: <defaults>
</compile_context>

<pallas_src>
import functools

import numpy as np

import jax
import jax.numpy as jnp
from jax import lax
from jax.experimental import pallas as pl
from jax.experimental.pallas import tpu as pltpu

LANE = 128
NEG = -1e30


def _round_up(n, m):
    return ((n + m - 1) // m) * m


def _pad2(a, rows, cols):
    out = jnp.zeros((rows, cols), a.dtype)
    return out.at[: a.shape[0], : a.shape[1]].set(a)


def _pad1(a, n):
    out = jnp.zeros((n,), a.dtype)
    return out.at[: a.shape[0]].set(a)


# ----------------------------------------------------------------------------
# Kernel 1: one SAGEConv layer + ReLU (block-sparse aggregation via scalar
#           prefetch index table)
#   out = relu( (A_mean @ x) @ W_l + b_l + x @ W_r )
# ----------------------------------------------------------------------------
def _sage_relu_kernel(cols_ref, cnt_ref, a_ref, xk_ref, xi_ref,
                      wl_ref, bl_ref, wr_ref, *ref_rest):
    acc_ref = ref_rest[-1]
    out_refs = ref_rest[:-1]
    i = pl.program_id(0)
    j = pl.program_id(1)

    @pl.when(j == 0)
    def _init():
        acc_ref[...] = jnp.zeros_like(acc_ref)

    # Padded table entries repeat the previous block index: the DMA is skipped
    # by Pallas (same block index) and the accumulate is skipped here.
    @pl.when(j < cnt_ref[i])
    def _accumulate():
        acc_ref[...] += jnp.dot(a_ref[...], xk_ref[...],
                                preferred_element_type=jnp.float32)

    @pl.when(j == pl.num_programs(1) - 1)
    def _epilogue():
        out = (jnp.dot(acc_ref[...].astype(jnp.bfloat16), wl_ref[...],
                       preferred_element_type=jnp.float32)
               + bl_ref[...]
               + jnp.dot(xi_ref[...], wr_ref[...],
                         preferred_element_type=jnp.float32))
        out = jnp.maximum(out, 0.0)
        for o_ref in out_refs:
            o_ref[...] = out.astype(o_ref.dtype)


def sage_relu(x_bf, a_bf16, cols_flat, counts, max_nnz, w_l, b_l, w_r, *,
              tm, tk, out_dtypes, nnz_blocks):
    """x_bf: (N_pad, F_pad) bf16; a_bf16: (N_pad, N_pad) bf16; weights bf16."""
    n_pad, f_pad = x_bf.shape
    h_pad = w_l.shape[1]
    n_i = n_pad // tm

    a_map = lambda i, j, cols, cnt: (i, cols[i * max_nnz + j])
    xk_map = lambda i, j, cols, cnt: (cols[i * max_nnz + j], 0)
    row_map = lambda i, j, cols, cnt: (i, 0)
    w_map = lambda i, j, cols, cnt: (0, 0)

    in_specs = [
        pl.BlockSpec((tm, tk), a_map),            # adjacency tile (bf16)
        pl.BlockSpec((tk, f_pad), xk_map),        # x K-slice (bf16)
        pl.BlockSpec((tm, f_pad), row_map),       # x row-slice (bf16)
        pl.BlockSpec((f_pad, h_pad), w_map),      # W_l (bf16)
        pl.BlockSpec((1, h_pad), w_map),          # b_l (f32)
        pl.BlockSpec((f_pad, h_pad), w_map),      # W_r (bf16)
    ]
    out_shape = [jax.ShapeDtypeStruct((n_pad, h_pad), dt) for dt in out_dtypes]
    out_specs = [pl.BlockSpec((tm, h_pad), row_map) for _ in out_dtypes]

    # Cost model counts only nonzero adjacency blocks (block-sparse stream).
    flops = (2 * nnz_blocks * tm * tk * f_pad
             + 2 * 2 * n_pad * f_pad * h_pad)
    out_bytes = sum(n_pad * h_pad * np.dtype(dt).itemsize for dt in out_dtypes)
    bytes_accessed = (nnz_blocks * tm * tk * 2          # nonzero A tiles
                      + nnz_blocks * tk * f_pad * 2     # streamed x K-slices
                      + n_pad * f_pad * 2               # x row-slices
                      + 2 * f_pad * h_pad * 2 + h_pad * 4
                      + out_bytes)

    grid_spec = pltpu.PrefetchScalarGridSpec(
        num_scalar_prefetch=2,
        grid=(n_i, max_nnz),
        in_specs=in_specs,
        out_specs=out_specs,
        scratch_shapes=[pltpu.VMEM((tm, f_pad), jnp.float32)],
    )

    return pl.pallas_call(
        _sage_relu_kernel,
        out_shape=out_shape,
        grid_spec=grid_spec,
        compiler_params=pltpu.CompilerParams(
            dimension_semantics=("parallel", "arbitrary"),
            vmem_limit_bytes=40 * 1024 * 1024,
        ),
        cost_estimate=pl.CostEstimate(flops=flops, transcendentals=0,
                                      bytes_accessed=bytes_accessed),
    )(cols_flat, counts, a_bf16, x_bf, x_bf, w_l, b_l, w_r)


# ----------------------------------------------------------------------------
# Kernel 2: tiled Set2Set pooling (4 LSTM steps, online segment-softmax over
#           N row-blocks) + MLP head + log_softmax
#   grid = (steps, n_row_blocks); LSTM / softmax state lives in VMEM scratch.
# ----------------------------------------------------------------------------
def _row_to_col(row):
    """(1, B) -> (B, 1) using only iota/select/reduce (no hardware transpose)."""
    b = row.shape[1]
    ii = lax.broadcasted_iota(jnp.int32, (b, b), 0)
    jj = lax.broadcasted_iota(jnp.int32, (b, b), 1)
    return jnp.sum(jnp.where(ii == jj, row, 0.0), axis=1, keepdims=True)


def _set2set_head_kernel(x_ref, m_ref, mt_ref, wih_ref, whh_ref, b_ref,
                         w1_ref, b1_ref, w2_ref, b2_ref, o_ref,
                         qstar_ref, h_ref, c_ref, q_ref,
                         mmax_ref, lsum_ref, racc_ref, *, num_classes):
    s = pl.program_id(0)
    n = pl.program_id(1)
    n_last = pl.num_programs(1) - 1
    hp = whh_ref.shape[0]

    @pl.when((s == 0) & (n == 0))
    def _init_state():
        qstar_ref[...] = jnp.zeros_like(qstar_ref)
        h_ref[...] = jnp.zeros_like(h_ref)
        c_ref[...] = jnp.zeros_like(c_ref)

    @pl.when(n == 0)
    def _lstm_and_reset():
        # LSTM cell (PyTorch gate order i, f, g, o; gate blocks are zero-padded,
        # so padded gate columns stay inert: g = tanh(0) = 0 and c starts at 0).
        gates = (jnp.dot(qstar_ref[...], wih_ref[...],
                         preferred_element_type=jnp.float32)
                 + jnp.dot(h_ref[...], whh_ref[...],
                           preferred_element_type=jnp.float32)
                 + b_ref[...])
        i_g = jax.nn.sigmoid(gates[:, 0 * hp:1 * hp])
        f_g = jax.nn.sigmoid(gates[:, 1 * hp:2 * hp])
        g_g = jnp.tanh(gates[:, 2 * hp:3 * hp])
        o_g = jax.nn.sigmoid(gates[:, 3 * hp:4 * hp])
        c_new = f_g * c_ref[...] + i_g * g_g
        h_new = o_g * jnp.tanh(c_new)
        c_ref[...] = c_new
        h_ref[...] = h_new
        q_ref[...] = h_new
        # reset online segment-softmax state
        mmax_ref[...] = jnp.full(mmax_ref.shape, NEG, mmax_ref.dtype)
        lsum_ref[...] = jnp.zeros_like(lsum_ref)
        racc_ref[...] = jnp.zeros_like(racc_ref)

    # ---- online segment softmax + readout for this N row-block ----
    x = x_ref[...]                                    # (tn, Hp) f32
    mf = m_ref[...].astype(jnp.float32)               # (tn, Bp)  one-hot
    mtf = mt_ref[...].astype(jnp.float32)             # (Bp, tn)  one-hot
    q = q_ref[...]                                    # (Bp, Hp)

    q_nodes = jnp.dot(mf, q, preferred_element_type=jnp.float32)    # (tn, Hp)
    e = jnp.sum(x * q_nodes, axis=-1, keepdims=True)                # (tn, 1)

    e_b = jnp.where(mf > 0.0, e, NEG)                               # (tn, Bp)
    blk_max_row = jnp.max(e_b, axis=0, keepdims=True)               # (1, Bp)
    m_old = mmax_ref[...]                                           # (Bp, 1)
    m_new = jnp.maximum(m_old, _row_to_col(blk_max_row))            # (Bp, 1)
    alpha = jnp.exp(m_old - m_new)                                  # (Bp, 1)

    node_max = jnp.dot(mf, m_new, preferred_element_type=jnp.float32)  # (tn,1)
    p = jnp.exp(e - node_max)                                       # (tn, 1)
    # padded nodes: mf row == 0 -> p == 1, but mtf columns are 0 -> inert.
    lsum_ref[...] = alpha * lsum_ref[...] + jnp.dot(
        mtf, p, preferred_element_type=jnp.float32)                 # (Bp, 1)
    racc_ref[...] = alpha * racc_ref[...] + jnp.dot(
        mtf, p * x, preferred_element_type=jnp.float32)             # (Bp, Hp)
    mmax_ref[...] = m_new

    @pl.when(n == n_last)
    def _finish_step():
        l = lsum_ref[...]
        safe = jnp.where(l > 0.0, l, 1.0)
        r = jnp.where(l > 0.0, racc_ref[...] / safe, 0.0)           # (Bp, Hp)
        qstar_ref[:, 0:hp] = q_ref[...]
        qstar_ref[:, hp:2 * hp] = r

    @pl.when((s == pl.num_programs(0) - 1) & (n == n_last))
    def _head():
        # MLP head: relu(lin1) -> (dropout identity) -> lin2 -> log_softmax.
        q_star = qstar_ref[...]
        hdn = jnp.maximum(
            jnp.dot(q_star, w1_ref[...], preferred_element_type=jnp.float32)
            + b1_ref[...], 0.0)
        logits = (jnp.dot(hdn, w2_ref[...], preferred_element_type=jnp.float32)
                  + b2_ref[...])
        col = lax.broadcasted_iota(jnp.int32, logits.shape, 1)
        logits = jnp.where(col < num_classes, logits, NEG)  # mask padded classes
        mx = jnp.max(logits, axis=-1, keepdims=True)
        lse = mx + jnp.log(jnp.sum(jnp.exp(logits - mx), axis=-1, keepdims=True))
        o_ref[...] = logits - lse


def set2set_head(x, m, mt, w_ih, w_hh, lstm_b, w1, b1, w2, b2, *,
                 steps, num_classes, tn):
    n_pad, h_pad = x.shape
    b_pad = mt.shape[0]
    c_pad = w2.shape[1]
    n_blocks = n_pad // tn

    kernel = functools.partial(_set2set_head_kernel, num_classes=num_classes)
    grid_spec = pltpu.PrefetchScalarGridSpec(
        num_scalar_prefetch=0,
        grid=(steps, n_blocks),
        in_specs=[
            pl.BlockSpec((tn, h_pad), lambda s, n: (n, 0)),        # x (f32)
            pl.BlockSpec((tn, b_pad), lambda s, n: (n, 0)),        # m (bf16)
            pl.BlockSpec((b_pad, tn), lambda s, n: (0, n)),        # m^T (bf16)
            pl.BlockSpec((2 * h_pad, 4 * h_pad), lambda s, n: (0, 0)),
            pl.BlockSpec((h_pad, 4 * h_pad), lambda s, n: (0, 0)),
            pl.BlockSpec((1, 4 * h_pad), lambda s, n: (0, 0)),
            pl.BlockSpec((2 * h_pad, h_pad), lambda s, n: (0, 0)),
            pl.BlockSpec((1, h_pad), lambda s, n: (0, 0)),
            pl.BlockSpec((h_pad, c_pad), lambda s, n: (0, 0)),
            pl.BlockSpec((1, c_pad), lambda s, n: (0, 0)),
        ],
        out_specs=pl.BlockSpec((b_pad, c_pad), lambda s, n: (0, 0)),
        scratch_shapes=[
            pltpu.VMEM((b_pad, 2 * h_pad), jnp.float32),   # q_star
            pltpu.VMEM((b_pad, h_pad), jnp.float32),       # h
            pltpu.VMEM((b_pad, h_pad), jnp.float32),       # c
            pltpu.VMEM((b_pad, h_pad), jnp.float32),       # q
            pltpu.VMEM((b_pad, 1), jnp.float32),           # running seg max
            pltpu.VMEM((b_pad, 1), jnp.float32),           # running seg sum
            pltpu.VMEM((b_pad, h_pad), jnp.float32),       # running readout acc
        ],
    )
    return pl.pallas_call(
        kernel,
        out_shape=jax.ShapeDtypeStruct((b_pad, c_pad), jnp.float32),
        grid_spec=grid_spec,
        compiler_params=pltpu.CompilerParams(
            dimension_semantics=("arbitrary", "arbitrary")),
    )(x, m, mt, w_ih, w_hh, lstm_b, w1, b1, w2, b2)


# ----------------------------------------------------------------------------
# Lane-padding packers for LSTM / head weights (gate-block aware)
# ----------------------------------------------------------------------------
def _pack_lstm_wih(w, h, hp):
    # w: (2H, 4H); input layout [q(H), r(H)] -> [q(Hp), r(Hp)], gates H -> Hp.
    out = jnp.zeros((2 * hp, 4 * hp), w.dtype)
    for g in range(4):
        blk = w[:, g * h:(g + 1) * h]
        out = out.at[0:h, g * hp:g * hp + h].set(blk[0:h])
        out = out.at[hp:hp + h, g * hp:g * hp + h].set(blk[h:2 * h])
    return out


def _pack_lstm_whh(w, h, hp):
    out = jnp.zeros((hp, 4 * hp), w.dtype)
    for g in range(4):
        out = out.at[0:h, g * hp:g * hp + h].set(w[:, g * h:(g + 1) * h])
    return out


def _pack_lstm_bias(b, h, hp):
    out = jnp.zeros((4 * hp,), b.dtype)
    for g in range(4):
        out = out.at[g * hp:g * hp + h].set(b[g * h:(g + 1) * h])
    return out


def _pack_lin1_w(w, h, hp, hout, hout_p):
    # w: (2H, Hout) with rows laid out as [q(H), r(H)] -> [q(Hp), r(Hp)].
    out = jnp.zeros((2 * hp, hout_p), w.dtype)
    out = out.at[0:h, 0:hout].set(w[0:h])
    out = out.at[hp:hp + h, 0:hout].set(w[h:2 * h])
    return out


# ----------------------------------------------------------------------------
# Full forward pass (not jitted: builds the block-sparse table host-side)
# ----------------------------------------------------------------------------
def set2set_net_forward(x, adj_mean, membership, params, *, hidden,
                        num_classes, steps=4):
    n, f = x.shape
    b = membership.shape[1]

    f_pad = _round_up(f, LANE)
    h_pad = _round_up(hidden, LANE)
    b_pad = _round_up(b, LANE)
    c_pad = _round_up(num_classes, LANE)

    # Node-dim tiling; keep >=2 row blocks whenever possible so both v7x
    # TensorCores get work on the "parallel" grid axis.
    if n > 512:
        n_pad = _round_up(n, 512)
        tm, tk = 512, 512
    elif n > 128:
        n_pad = _round_up(n, 256)
        tm, tk = n_pad // 2, n_pad
    else:
        n_pad = LANE
        tm = tk = LANE

    # --- block-sparse adjacency table (host side, numpy) ---
    adj_np = np.asarray(adj_mean, dtype=np.float32)
    a_pad_np = np.zeros((n_pad, n_pad), np.float32)
    a_pad_np[:n, :n] = adj_np
    n_i, n_k = n_pad // tm, n_pad // tk
    nz = a_pad_np.reshape(n_i, tm, n_k, tk).any(axis=(1, 3))
    counts_np = nz.sum(axis=1).astype(np.int32)
    max_nnz = max(int(counts_np.max()), 1)
    cols_np = np.zeros((n_i, max_nnz), np.int32)
    for i in range(n_i):
        idx = np.nonzero(nz[i])[0]
        if idx.size == 0:
            idx = np.array([0], dtype=np.int64)
        cols_np[i, :idx.size] = idx
        cols_np[i, idx.size:] = idx[-1]   # repeat last -> Pallas skips the DMA
    nnz_blocks = int(counts_np.sum())

    a_bf16 = jnp.asarray(a_pad_np).astype(jnp.bfloat16)
    cols_flat = jnp.asarray(cols_np.reshape(-1), dtype=jnp.int32)
    counts = jnp.asarray(counts_np, dtype=jnp.int32)

    # Padded one-hot membership (bf16 is exact for 0/1); transpose precomputed.
    m_pad = _pad2(membership, n_pad, b_pad).astype(jnp.bfloat16)
    mt_pad = _pad2(membership.T, b_pad, n_pad).astype(jnp.bfloat16)

    # --- SAGEConv stack (bf16 feed, f32 accumulate) ---
    layers = [(params["conv1_wl"], params["conv1_bl"], params["conv1_wr"])]
    layers += list(params["convs"])

    cur_bf = _pad2(x, n_pad, f_pad).astype(jnp.bfloat16)
    x_f32 = None
    for li, (wl, bl, wr) in enumerate(layers):
        in_pad = f_pad if li == 0 else h_pad
        wl_p = _pad2(wl, in_pad, h_pad).astype(jnp.bfloat16)
        wr_p = _pad2(wr, in_pad, h_pad).astype(jnp.bfloat16)
        bl_p = _pad1(bl, h_pad).reshape(1, -1)
        last = li == len(layers) - 1
        out_dtypes = (jnp.float32,) if last else (jnp.bfloat16,)
        outs = sage_relu(cur_bf, a_bf16, cols_flat, counts, max_nnz,
                         wl_p, bl_p, wr_p, tm=tm, tk=tk,
                         out_dtypes=out_dtypes, nnz_blocks=nnz_blocks)
        if last:
            x_f32 = outs[0]
        else:
            cur_bf = outs[0]   # bf16 copy emitted by the epilogue

    # --- fused Set2Set + head (dropout is identity at inference) ---
    w_ih = _pack_lstm_wih(params["lstm_wih"], hidden, h_pad)
    w_hh = _pack_lstm_whh(params["lstm_whh"], hidden, h_pad)
    lstm_b = _pack_lstm_bias(params["lstm_b"], hidden, h_pad).reshape(1, -1)
    w1 = _pack_lin1_w(params["lin1_w"], hidden, h_pad, hidden, h_pad)
    b1 = _pad1(params["lin1_b"], h_pad).reshape(1, -1)
    w2 = _pad2(params["lin2_w"], h_pad, c_pad)
    b2 = _pad1(params["lin2_b"], c_pad).reshape(1, -1)

    tn = 512 if n_pad > 512 else n_pad
    out_pad = set2set_head(x_f32, m_pad, mt_pad, w_ih, w_hh, lstm_b,
                           w1, b1, w2, b2, steps=steps,
                           num_classes=num_classes, tn=tn)
    return out_pad[:b, :num_classes]


# ----------------------------------------------------------------------------
# Setup / demo
# ----------------------------------------------------------------------------
def build_graph_structure(num_nodes, nodes_per_graph):
    """Ring graph within each connected component; returns (A_mean, M, batch)."""
    src, dst = [], []
    for i in range(num_nodes):
        g0 = (i // nodes_per_graph) * nodes_per_graph
        nxt = g0 + (i - g0 + 1) % nodes_per_graph
        prv = g0 + (i - g0 - 1) % nodes_per_graph
        src += [nxt, prv]
        dst += [i, i]
    src = jnp.array(src, dtype=jnp.int32)
    dst = jnp.array(dst, dtype=jnp.int32)

    adj = jnp.zeros((num_nodes, num_nodes), dtype=jnp.float32)
    adj = adj.at[dst, src].add(1.0)                    # row i: incoming nbrs of i
    deg = jnp.maximum(adj.sum(axis=1, keepdims=True), 1.0)
    adj_mean = adj / deg                               # mean aggregation

    batch = jnp.arange(num_nodes, dtype=jnp.int32) // nodes_per_graph
    num_graphs = num_nodes // nodes_per_graph
    membership = jax.nn.one_hot(batch, num_graphs, dtype=jnp.float32)  # (N, B)
    return adj_mean, membership, batch


def init_params(key, num_features, hidden, num_classes, num_layers):
    ks = jax.random.split(key, 32)
    k = iter(ks)

    def lin(kk, fan_in, fan_out):
        return jax.random.normal(kk, (fan_in, fan_out), jnp.float32) * 0.1

    params = {
        "conv1_wl": lin(next(k), num_features, hidden),
        "conv1_bl": jax.random.normal(next(k), (hidden,), jnp.float32) * 0.1,
        "conv1_wr": lin(next(k), num_features, hidden),
        "convs": [],
    }
    for _ in range(num_layers - 1):
        params["convs"].append((
            lin(next(k), hidden, hidden),
            jax.random.normal(next(k), (hidden,), jnp.float32) * 0.1,
            lin(next(k), hidden, hidden),
        ))
    params["lstm_wih"] = lin(next(k), 2 * hidden, 4 * hidden)
    params["lstm_whh"] = lin(next(k), hidden, 4 * hidden)
    b_ih = jax.random.normal(next(k), (4 * hidden,), jnp.float32) * 0.1
    b_hh = jax.random.normal(next(k), (4 * hidden,), jnp.float32) * 0.1
    params["lstm_b"] = b_ih + b_hh
    params["lin1_w"] = lin(next(k), 2 * hidden, hidden)
    params["lin1_b"] = jax.random.normal(next(k), (hidden,), jnp.float32) * 0.1
    params["lin2_w"] = lin(next(k), hidden, num_classes)
    params["lin2_b"] = jax.random.normal(next(k), (num_classes,), jnp.float32) * 0.1
    return params


def reference_forward(x, adj_mean, membership, params, *, hidden, steps=4):
    """Pure-JAX reference mirroring the kernels' bf16 rounding on MXU inputs."""
    def bf(v):
        return v.astype(jnp.bfloat16).astype(jnp.float32)

    a32 = bf(adj_mean)
    xx = bf(x)
    layers = [(params["conv1_wl"], params["conv1_bl"], params["conv1_wr"])]
    layers += list(params["convs"])
    for li, (wl, bl, wr) in enumerate(layers):
        agg = bf(a32 @ xx)
        out = jnp.maximum(agg @ bf(wl) + bl + xx @ bf(wr), 0.0)
        xx = out if li == len(layers) - 1 else bf(out)
    xfin = xx

    m = membership
    mt = m.T
    bsz, h = m.shape[1], hidden
    wih, whh, bias = params["lstm_wih"], params["lstm_whh"], params["lstm_b"]
    q_star = jnp.zeros((bsz, 2 * h))
    hh = jnp.zeros((bsz, h))
    cc = jnp.zeros((bsz, h))
    for _ in range(steps):
        gates = q_star @ wih + hh @ whh + bias
        i_g = jax.nn.sigmoid(gates[:, 0 * h:1 * h])
        f_g = jax.nn.sigmoid(gates[:, 1 * h:2 * h])
        g_g = jnp.tanh(gates[:, 2 * h:3 * h])
        o_g = jax.nn.sigmoid(gates[:, 3 * h:4 * h])
        cc = f_g * cc + i_g * g_g
        hh = o_g * jnp.tanh(cc)
        q = hh
        e = jnp.sum(xfin * (m @ q), axis=-1, keepdims=True)
        e_m = jnp.where(m > 0, e, -1e30)
        seg_max = jnp.max(e_m, axis=0, keepdims=True)
        node_max = jnp.sum(m * seg_max, axis=1, keepdims=True)
        p = jnp.exp(e - node_max)
        node_sum = m @ (mt @ p)
        a = p / node_sum
        r = mt @ (a * xfin)
        q_star = jnp.concatenate([q, r], axis=-1)

    hdn = jnp.maximum(q_star @ params["lin1_w"] + params["lin1_b"], 0.0)
    logits = hdn @ params["lin2_w"] + params["lin2_b"]
    return jax.nn.log_softmax(logits, axis=-1)


if __name__ == "__main__":
    # Small synthetic "dataset": 2 graphs x 8 nodes, 8 input features,
    # hidden=32, 4 classes, num_layers=2 (conv1 + 1 extra SAGEConv).
    NUM_NODES = 16
    NODES_PER_GRAPH = 8
    NUM_FEATURES = 8
    HIDDEN = 32
    NUM_CLASSES = 4
    NUM_LAYERS = 2

    key = jax.random.PRNGKey(0)
    k_x, k_p = jax.random.split(key)

    x = jax.random.normal(k_x, (NUM_NODES, NUM_FEATURES), jnp.float32)
    adj_mean, membership, batch = build_graph_structure(NUM_NODES, NODES_PER_GRAPH)
    params = init_params(k_p, NUM_FEATURES, HIDDEN, NUM_CLASSES, NUM_LAYERS)

    out = set2set_net_forward(x, adj_mean, membership, params,
                              hidden=HIDDEN, num_classes=NUM_CLASSES)
    out = jax.block_until_ready(out)

    ref = reference_forward(x, adj_mean, membership, params, hidden=HIDDEN)
    ref = jax.block_until_ready(ref)

    assert out.shape == (NUM_NODES // NODES_PER_GRAPH, NUM_CLASSES)
    assert bool(jnp.all(jnp.isfinite(out)))
    # log_softmax rows should (exp-)sum to ~1
    assert bool(jnp.allclose(jnp.sum(jnp.exp(out), axis=-1), 1.0, atol=1e-4))
    # match pure-JAX reference (bf16-rounded MXU-input path)
    assert bool(jnp.allclose(out, ref, atol=1e-2, rtol=1e-2))
    print("KERNEL_OK")
</pallas_src>

<mosaic_0001>
module attributes {stable_mosaic.version = 11 : i64} {
  func.func @_sage_relu_kernel(%arg0: i32, %arg1: i32, %arg2: memref<1xi32, #tpu.memory_space<smem>>, %arg3: memref<1xi32, #tpu.memory_space<smem>>, %arg4: memref<128x128xbf16, #tpu.memory_space<vmem>>, %arg5: memref<128x128xbf16, #tpu.memory_space<vmem>>, %arg6: memref<128x128xbf16, #tpu.memory_space<vmem>>, %arg7: memref<128x128xbf16, #tpu.memory_space<vmem>>, %arg8: memref<1x128xf32, #tpu.memory_space<vmem>>, %arg9: memref<128x128xbf16, #tpu.memory_space<vmem>>, %arg10: memref<128x128xbf16, #tpu.memory_space<vmem>>, %arg11: memref<128x128xf32, #tpu.memory_space<vmem>>) attributes {dimension_semantics = [#tpu.dimension_semantics<parallel>, #tpu.dimension_semantics<arbitrary>], iteration_bounds = array<i64: 1, 1>, scalar_prefetch = 2 : i64, scratch_operands = 1 : i64, tpu.core_type = #tpu.core_type<tc>, window_params = [{transform_indices = @transform_0, window_bounds = array<i64: 128, 128>}, {transform_indices = @transform_1, window_bounds = array<i64: 128, 128>}, {transform_indices = @transform_2, window_bounds = array<i64: 128, 128>}, {pipeline_mode = #tpu.pipeline_mode<synchronous>, transform_indices = @transform_3, window_bounds = array<i64: 128, 128>}, {pipeline_mode = #tpu.pipeline_mode<synchronous>, transform_indices = @transform_4, window_bounds = array<i64: 1, 128>}, {pipeline_mode = #tpu.pipeline_mode<synchronous>, transform_indices = @transform_5, window_bounds = array<i64: 128, 128>}, {transform_indices = @transform_6, window_bounds = array<i64: 128, 128>}]} {
    %c0_i32 = arith.constant 0 : i32
    %0 = arith.cmpi eq, %arg1, %c0_i32 : i32
    %1 = arith.extui %0 : i1 to i32
    %c0_i32_0 = arith.constant 0 : i32
    %2 = arith.cmpi ne, %1, %c0_i32_0 : i32
    scf.if %2 {
      %cst = arith.constant 0.000000e+00 : f32
      %11 = vector.broadcast %cst : f32 to vector<128x128xf32>
      %c0 = arith.constant 0 : index
      %c0_4 = arith.constant 0 : index
      %12 = vector.load %arg11[%c0, %c0_4] : memref<128x128xf32, #tpu.memory_space<vmem>>, vector<128x128xf32>
      tpu.vector_store %arg11[%c0, %c0_4], %11 {strides = array<i32>} : memref<128x128xf32, #tpu.memory_space<vmem>>, vector<128x128xf32>,
    } else {
    }
    %3 = arith.index_cast %arg0 : i32 to index
    %4 = memref.load %arg3[%3] : memref<1xi32, #tpu.memory_space<smem>>
    %5 = arith.cmpi slt, %arg1, %4 : i32
    %6 = arith.extui %5 : i1 to i32
    %c0_i32_1 = arith.constant 0 : i32
    %7 = arith.cmpi ne, %6, %c0_i32_1 : i32
    scf.if %7 {
      %c0 = arith.constant 0 : index
      %c0_4 = arith.constant 0 : index
      %11 = vector.load %arg11[%c0, %c0_4] : memref<128x128xf32, #tpu.memory_space<vmem>>, vector<128x128xf32>
      %c0_5 = arith.constant 0 : index
      %c0_6 = arith.constant 0 : index
      %12 = vector.load %arg4[%c0_5, %c0_6] : memref<128x128xbf16, #tpu.memory_space<vmem>>, vector<128x128xbf16>
      %c0_7 = arith.constant 0 : index
      %c0_8 = arith.constant 0 : index
      %13 = vector.load %arg5[%c0_7, %c0_8] : memref<128x128xbf16, #tpu.memory_space<vmem>>, vector<128x128xbf16>
      %cst = arith.constant dense<0.000000e+00> : vector<128x128xf32>
      %14 = tpu.matmul %12, %13, %cst {dimension_numbers = #tpu.dot_dimension_numbers<[1], [0], [0], [1], [0, 0, 1, 1], [], []>} : vector<128x128xbf16>, vector<128x128xbf16>, vector<128x128xf32> -> vector<128x128xf32>
      %15 = arith.addf %11, %14 : vector<128x128xf32>
      %c0_9 = arith.constant 0 : index
      %c0_10 = arith.constant 0 : index
      %16 = vector.load %arg11[%c0_9, %c0_10] : memref<128x128xf32, #tpu.memory_space<vmem>>, vector<128x128xf32>
      tpu.vector_store %arg11[%c0_9, %c0_10], %15 {strides = array<i32>} : memref<128x128xf32, #tpu.memory_space<vmem>>, vector<128x128xf32>,
    } else {
    }
    %c0_i32_2 = arith.constant 0 : i32
    %8 = arith.cmpi eq, %arg1, %c0_i32_2 : i32
    %9 = arith.extui %8 : i1 to i32
    %c0_i32_3 = arith.constant 0 : i32
    %10 = arith.cmpi ne, %9, %c0_i32_3 : i32
    scf.if %10 {
      %c0 = arith.constant 0 : index
      %c0_4 = arith.constant 0 : index
      %11 = vector.load %arg11[%c0, %c0_4] : memref<128x128xf32, #tpu.memory_space<vmem>>, vector<128x128xf32>
      %12 = arith.truncf %11 : vector<128x128xf32> to vector<128x128xbf16>
      %c0_5 = arith.constant 0 : index
      %c0_6 = arith.constant 0 : index
      %13 = vector.load %arg7[%c0_5, %c0_6] : memref<128x128xbf16, #tpu.memory_space<vmem>>, vector<128x128xbf16>
      %cst = arith.constant dense<0.000000e+00> : vector<128x128xf32>
      %14 = tpu.matmul %12, %13, %cst {dimension_numbers = #tpu.dot_dimension_numbers<[1], [0], [0], [1], [0, 0, 1, 1], [], []>} : vector<128x128xbf16>, vector<128x128xbf16>, vector<128x128xf32> -> vector<128x128xf32>
      %c0_7 = arith.constant 0 : index
      %c0_8 = arith.constant 0 : index
      %15 = vector.load %arg8[%c0_7, %c0_8] : memref<1x128xf32, #tpu.memory_space<vmem>>, vector<1x128xf32>
      %16 = vector.broadcast %15 : vector<1x128xf32> to vector<128x128xf32>
      %17 = arith.addf %14, %16 : vector<128x128xf32>
      %c0_9 = arith.constant 0 : index
      %c0_10 = arith.constant 0 : index
      %18 = vector.load %arg6[%c0_9, %c0_10] : memref<128x128xbf16, #tpu.memory_space<vmem>>, vector<128x128xbf16>
      %c0_11 = arith.constant 0 : index
      %c0_12 = arith.constant 0 : index
      %19 = vector.load %arg9[%c0_11, %c0_12] : memref<128x128xbf16, #tpu.memory_space<vmem>>, vector<128x128xbf16>
      %cst_13 = arith.constant dense<0.000000e+00> : vector<128x128xf32>
      %20 = tpu.matmul %18, %19, %cst_13 {dimension_numbers = #tpu.dot_dimension_numbers<[1], [0], [0], [1], [0, 0, 1, 1], [], []>} : vector<128x128xbf16>, vector<128x128xbf16>, vector<128x128xf32> -> vector<128x128xf32>
      %21 = arith.addf %17, %20 : vector<128x128xf32>
      %cst_14 = arith.constant 0.000000e+00 : f32
      %22 = vector.broadcast %cst_14 : f32 to vector<128x128xf32>
      %23 = arith.maximumf %21, %22 : vector<128x128xf32>
      %24 = arith.truncf %23 : vector<128x128xf32> to vector<128x128xbf16>
      %c0_15 = arith.constant 0 : index
      %c0_16 = arith.constant 0 : index
      %25 = vector.load %arg10[%c0_15, %c0_16] : memref<128x128xbf16, #tpu.memory_space<vmem>>, vector<128x128xbf16>
      tpu.vector_store %arg10[%c0_15, %c0_16], %24 {strides = array<i32>} : memref<128x128xbf16, #tpu.memory_space<vmem>>, vector<128x128xbf16>,
    } else {
    }
    return
  }
  func.func @transform_0(%arg0: i32, %arg1: i32, %arg2: memref<1xi32, #tpu.memory_space<smem>>, %arg3: memref<1xi32, #tpu.memory_space<smem>>) -> (i32, i32) {
    %c1_i32 = arith.constant 1 : i32
    %0 = arith.muli %arg0, %c1_i32 : i32
    %1 = arith.addi %0, %arg1 : i32
    %2 = arith.index_cast %1 : i32 to index
    %3 = memref.load %arg2[%2] : memref<1xi32, #tpu.memory_space<smem>>
    %c0_i32 = arith.constant 0 : i32
    return %arg0, %3 : i32, i32
  }
  func.func @transform_1(%arg0: i32, %arg1: i32, %arg2: memref<1xi32, #tpu.memory_space<smem>>, %arg3: memref<1xi32, #tpu.memory_space<smem>>) -> (i32, i32) {
    %c1_i32 = arith.constant 1 : i32
    %0 = arith.muli %arg0, %c1_i32 : i32
    %1 = arith.addi %0, %arg1 : i32
    %2 = arith.index_cast %1 : i32 to index
    %3 = memref.load %arg2[%2] : memref<1xi32, #tpu.memory_space<smem>>
    %c0_i32 = arith.constant 0 : i32
    %c0_i32_0 = arith.constant 0 : i32
    return %3, %c0_i32 : i32, i32
  }
  func.func @transform_2(%arg0: i32, %arg1: i32, %arg2: memref<1xi32, #tpu.memory_space<smem>>, %arg3: memref<1xi32, #tpu.memory_space<smem>>) -> (i32, i32) {
    %c0_i32 = arith.constant 0 : i32
    %c0_i32_0 = arith.constant 0 : i32
    return %arg0, %c0_i32 : i32, i32
  }
  func.func @transform_3(%arg0: i32, %arg1: i32, %arg2: memref<1xi32, #tpu.memory_space<smem>>, %arg3: memref<1xi32, #tpu.memory_space<smem>>) -> (i32, i32) {
    %c0_i32 = arith.constant 0 : i32
    %c0_i32_0 = arith.constant 0 : i32
    %c0_i32_1 = arith.constant 0 : i32
    return %c0_i32, %c0_i32_0 : i32, i32
  }
  func.func @transform_4(%arg0: i32, %arg1: i32, %arg2: memref<1xi32, #tpu.memory_space<smem>>, %arg3: memref<1xi32, #tpu.memory_space<smem>>) -> (i32, i32) {
    %c0_i32 = arith.constant 0 : i32
    %c0_i32_0 = arith.constant 0 : i32
    %c0_i32_1 = arith.constant 0 : i32
    return %c0_i32, %c0_i32_0 : i32, i32
  }
  func.func @transform_5(%arg0: i32, %arg1: i32, %arg2: memref<1xi32, #tpu.memory_space<smem>>, %arg3: memref<1xi32, #tpu.memory_space<smem>>) -> (i32, i32) {
    %c0_i32 = arith.constant 0 : i32
    %c0_i32_0 = arith.constant 0 : i32
    %c0_i32_1 = arith.constant 0 : i32
    return %c0_i32, %c0_i32_0 : i32, i32
  }
  func.func @transform_6(%arg0: i32, %arg1: i32, %arg2: memref<1xi32, #tpu.memory_space<smem>>, %arg3: memref<1xi32, #tpu.memory_space<smem>>) -> (i32, i32) {
    %c0_i32 = arith.constant 0 : i32
    %c0_i32_0 = arith.constant 0 : i32
    return %arg0, %c0_i32 : i32, i32
  }
}

</mosaic_0001>

<bundles_post_ra>
// kernel: tpu_custom_call.1
= control target key start
LH: loop header
LB: loop body
LE: loop exit
PB: predicated region body
PF: predicated region fallthrough
CT: control target
= control target key end

     0   :  { %15 = vsyncpa [#allocation7], 0  ;;  %s1657_s0 = inlined_call_operand.<no memory space> [shape: s32[1], index: 0, kind: input, shape index: {}]   ;;  %s1658_s1 = inlined_call_operand.<no memory space> [shape: s32[1], index: 1, kind: input, shape index: {}]   ;;  %s1659_s2 = inlined_call_operand.hbm [shape: bf16[128,128], index: 2, kind: input, shape index: {}]   ;;  %s1660_s3 = inlined_call_operand.hbm [shape: bf16[128,128], index: 3, kind: input, shape index: {}]   ;;  %s1661_s4 = inlined_call_operand.hbm [shape: bf16[128,128], index: 4, kind: input, shape index: {}]   ;;  %s1662_s5 = inlined_call_operand.hbm [shape: bf16[128,128], index: 5, kind: input, shape index: {}]   ;;  %s1663_s6 = inlined_call_operand.vmem [shape: f32[1,128], index: 6, kind: input, shape index: {}]   ;;  %s1664_s7 = inlined_call_operand.hbm [shape: bf16[128,128], index: 7, kind: input, shape index: {}]   ;;  %s1665_s8 = inlined_call_operand.hbm [shape: bf16[128,128], index: 8, kind: output, shape index: {}]  }
   0x1   :  { %16 = vsyncpa [#allocation10], 0 }
   0x2   :  { %17 = vsyncpa [#allocation13], 0 }
   0x3   :  { %18 = vsyncpa [#allocation8], 0  ;;  %s1026_s29 = sshll.u32 %s1657_s0, 10  ;;  %s1475_s11 = smov [#allocation9]  }
   0x4   :  { %s44_s10 = scalar_lea.hbm %s1660_s3, %s1026_s29  ;;  %s45_s12 = sshll.u32 %s1475_s11, 4  ;;  %s46_s12 = int_to_ptr.vmem [resolvable:$true] %s45_s12 }
   0x5   :  { %s1331_s13 = scalar_lea.hbm %s44_s10, 1024  ;;  %s1333_s16 = scalar_lea.hbm %s1660_s3, 1024 }
   0x6   :  { %p1332_p0 = scmp.ne.s32.totalorder %s44_s10, %s1331_s13  ;;  %p1334_p1 = scmp.lt.u32.totalorder %s44_s10, %s1660_s3 }
   0x7   :  { %p1335_p2 = scmp.lt.u32.totalorder %s1333_s16, %s1331_s13  ;;  %p1337_p4 = scmp.lt.u32.totalorder %s1331_s13, %s44_s10 }
   0x9   :  { %p1336_p3 = por %p1335_p2, %p1334_p1 }
   0xb   :  { %p1338_p5 = por %p1337_p4, %p1336_p3 }
   0xd   :  { %p1339_p6 = pnand %p1338_p5, %p1332_p0 }
   0xf   :  { %1342 = shalt.err (!%p1339_p6)
}
  0x10   :  { %s1343_s19 = scalar_lea.vmem %s46_s12, 1024  ;;  %p1348_p8 = scmp.lt.s32.totalorder %s46_s12, %s46_s12 }
  0x11   :  { %p1344_p7 = scmp.ne.s32.totalorder %s46_s12, %s1343_s19  ;;  %p1349_p9 = scmp.lt.s32.totalorder %s1343_s19, %s1343_s19 }
  0x13   :  { %p1350_p10 = por %p1349_p9, %p1348_p8 }
  0x15   :  { %p1351_p11 = pnand %p1350_p10, %p1344_p7 }
  0x17   :  { %1354 = shalt.err (!%p1351_p11)
}
  0x18   :  { %s1476_s20 = smov 64   ;;  %s1477_s21 = smov 4  }
  0x19   :  { %51 = dma.hbm_to_vmem [thread:$0]  %s44_s10, 1024, %s46_s12, [#allocation10], %s1476_s20, %s1476_s20, %s1477_s21  }
  0x1a   :  { %s1478_s3 = smov [#allocation12]   ;;  %s964_s25 = sshll.u32 %s1657_s0, 6 }
  0x1b   :  { %s69_s22 = sshll.u32 %s1478_s3, 4  ;;  %s1550_s28 = scalar_lea.hbm %s1659_s2, %s964_s25  ;;  %s70_s22 = int_to_ptr.vmem [resolvable:$true] %s69_s22 }
  0x1c   :  { %s1355_s9 = scalar_lea.hbm %s1662_s5, 1024 }
  0x1d   :  { %p1356_p12 = scmp.ne.s32.totalorder %s1662_s5, %s1355_s9  ;;  %p1359_p13 = scmp.lt.u32.totalorder %s1355_s9, %s1662_s5 }
  0x1f   :  { %p1361_p0 = pnand %p1359_p13, %p1356_p12 }
  0x21   :  { %1364 = shalt.err (!%p1361_p0)
}
  0x22   :  { %s1365_s0 = scalar_lea.vmem %s70_s22, 1024  ;;  %p1370_p2 = scmp.lt.s32.totalorder %s70_s22, %s70_s22 }
  0x23   :  { %p1366_p1 = scmp.ne.s32.totalorder %s70_s22, %s1365_s0  ;;  %p1371_p3 = scmp.lt.s32.totalorder %s1365_s0, %s1365_s0 }
  0x25   :  { %p1372_p4 = por %p1371_p3, %p1370_p2 }
  0x27   :  { %p1373_p5 = pnand %p1372_p4, %p1366_p1 }
  0x29   :  { %1376 = shalt.err (!%p1373_p5)
}
  0x2a   :  { %75 = dma.hbm_to_vmem [thread:$0]  %s1662_s5, 1024, %s70_s22, [#allocation13], %s1476_s20, %s1476_s20, %s1477_s21  }
  0x2b   :  { %s1479_s16 = smov [#allocation6]   ;;  %s1480_s18 = smov [#allocation11]  }
  0x2c   :  { %s28_s17 = sshll.u32 %s1479_s16, 4  ;;  %s57_s19 = sshll.u32 %s1480_s18, 4  ;;  %s29_s17 = int_to_ptr.vmem [resolvable:$true] %s28_s17  ;;  %s1567_s19 = int_to_ptr.vmem [resolvable:$true] %s57_s19 }
  0x2d   :  { %s1377_s3 = scalar_lea.hbm %s1550_s28, 1024  ;;  %s1379_s25 = scalar_lea.hbm %s1659_s2, 1024 }
  0x2e   :  { %p1378_p6 = scmp.ne.s32.totalorder %s1550_s28, %s1377_s3  ;;  %p1380_p7 = scmp.lt.u32.totalorder %s1550_s28, %s1659_s2 }
  0x2f   :  { %p1381_p8 = scmp.lt.u32.totalorder %s1379_s25, %s1377_s3  ;;  %p1383_p10 = scmp.lt.u32.totalorder %s1377_s3, %s1550_s28 }
  0x31   :  { %p1382_p9 = por %p1381_p8, %p1380_p7 }
  0x33   :  { %p1384_p11 = por %p1383_p10, %p1382_p9 }
  0x35   :  { %p1385_p12 = pnand %p1384_p11, %p1378_p6 }
  0x37   :  { %1388 = shalt.err (!%p1385_p12)
}
  0x38   :  { %s1389_s5 = scalar_lea.vmem %s29_s17, 1024  ;;  %p1394_p0 = scmp.lt.s32.totalorder %s29_s17, %s29_s17 }
  0x39   :  { %p1390_p13 = scmp.ne.s32.totalorder %s29_s17, %s1389_s5  ;;  %p1395_p1 = scmp.lt.s32.totalorder %s1389_s5, %s1389_s5 }
  0x3b   :  { %p1396_p2 = por %p1395_p1, %p1394_p0 }
  0x3d   :  { %p1397_p3 = pnand %p1396_p2, %p1390_p13 }
  0x3f   :  { %1400 = shalt.err (!%p1397_p3)
}
  0x40   :  { %34 = dma.hbm_to_vmem [thread:$0]  %s1550_s28, 1024, %s29_s17, [#allocation7], %s1476_s20, %s1476_s20, %s1477_s21  }
  0x41   :  { %s1401_s29 = scalar_lea.hbm %s1661_s4, 1024 }
  0x42   :  { %p1402_p4 = scmp.ne.s32.totalorder %s1661_s4, %s1401_s29  ;;  %p1405_p5 = scmp.lt.u32.totalorder %s1401_s29, %s1661_s4 }
  0x44   :  { %p1407_p6 = pnand %p1405_p5, %p1402_p4 }
  0x46   :  { %1410 = shalt.err (!%p1407_p6)
}
  0x47   :  { %s1411_s10 = scalar_lea.vmem %s1567_s19, 1024  ;;  %p1416_p8 = scmp.lt.s32.totalorder %s1567_s19, %s1567_s19 }
  0x48   :  { %p1412_p7 = scmp.ne.s32.totalorder %s1567_s19, %s1411_s10  ;;  %p1417_p9 = scmp.lt.s32.totalorder %s1411_s10, %s1411_s10 }
  0x4a   :  { %p1418_p10 = por %p1417_p9, %p1416_p8 }
  0x4c   :  { %p1419_p11 = pnand %p1418_p10, %p1412_p7 }
  0x4e   :  { %1422 = shalt.err (!%p1419_p11)
}
  0x4f   :  { %63 = dma.hbm_to_vmem [thread:$0]  %s1661_s4, 1024, %s1567_s19, [#allocation10], %s1476_s20, %s1476_s20, %s1477_s21  }
  0x50   :  { %s1481_s0 = smov [#allocation14]   ;;  %s1423_s17 = scalar_lea.hbm %s1664_s7, 1024 }
  0x51   :  { %s83_s14 = sshll.u32 %s1481_s0, 4  ;;  %p1424_p12 = scmp.ne.s32.totalorder %s1664_s7, %s1423_s17  ;;  %s84_s14 = int_to_ptr.vmem [resolvable:$true] %s83_s14 }
  0x52   :  { %p1427_p13 = scmp.lt.u32.totalorder %s1423_s17, %s1664_s7 }
  0x54   :  { %p1429_p0 = pnand %p1427_p13, %p1424_p12 }
  0x56   :  { %1432 = shalt.err (!%p1429_p0)
}
  0x57   :  { %s1433_s25 = scalar_lea.vmem %s84_s14, 1024  ;;  %p1438_p2 = scmp.lt.s32.totalorder %s84_s14, %s84_s14 }
  0x58   :  { %p1434_p1 = scmp.ne.s32.totalorder %s84_s14, %s1433_s25  ;;  %p1439_p3 = scmp.lt.s32.totalorder %s1433_s25, %s1433_s25 }
  0x5a   :  { %p1440_p4 = por %p1439_p3, %p1438_p2 }
  0x5c   :  { %p1441_p5 = pnand %p1440_p4, %p1434_p1 }
  0x5e   :  { %1444 = shalt.err (!%p1441_p5)
}
  0x5f   :  { %89 = dma.hbm_to_vmem [thread:$0]  %s1664_s7, 1024, %s84_s14, [#allocation13], %s1476_s20, %s1476_s20, %s1477_s21  }
  0x60   :  { %1467 = dma.done.wait [#allocation7], 1024  }
  0x61   :  { %1468 = vsyncadd [#allocation7], 4294966272 }
  0x62   :  { %1469 = dma.done.wait [#allocation10], 2048  }
  0x63   :  { %1470 = vsyncadd [#allocation10], 4294965248 }
  0x64   :  { %1471 = dma.done.wait [#allocation13], 2048  }
  0x65   :  { %1472 = vsyncadd [#allocation13], 4294965248  ;;  %v1482_v0 = vmov 0.0   ;;  %p968_p6 = scmp.le.s32.totalorder %s1658_s1, 0 }
  0x66   :  { %115 = vst [vmem:[#allocation2] sm:$0xff] %v1482_v0  ;;  %116 = vst [vmem:[#allocation2 + $0x8] sm:$0xff] %v1482_v0  ;;  %v1291_v1 = vld [vmem:[#allocation9] sm:$0xff] (!%p968_p6)   ;;  %v1292_v2 = vld [vmem:[#allocation9 + $0x8] sm:$0xff] (!%p968_p6)  }
  0x67   :  { %117 = vst [vmem:[#allocation2 + $0x10] sm:$0xff] %v1482_v0  ;;  %118 = vst [vmem:[#allocation2 + $0x18] sm:$0xff] %v1482_v0  ;;  %135 = sbr.rel (%p968_p6) target bundleno = 361 (0x169), region = 53  ;;  %1138 = vmatprep.subr.bf16.mxu0 (!%p968_p6), %v1291_v1  ;;  %1234 = vmatprep.subr.bf16.mxu1 (!%p968_p6), %v1291_v1  ;;  %v1293_v3 = vld [vmem:[#allocation9 + $0x10] sm:$0xff] (!%p968_p6)   ;;  %v1294_v4 = vld [vmem:[#allocation9 + $0x18] sm:$0xff] (!%p968_p6)  }
  0x68   :  { %119 = vst [vmem:[#allocation2 + $0x20] sm:$0xff] %v1482_v0  ;;  %120 = vst [vmem:[#allocation2 + $0x28] sm:$0xff] %v1482_v0  ;;  %1139 = vmatpush3.bf16.msra.mxu0 (!%p968_p6), %v1291_v1  ;;  %1242 = vmatpush3.bf16.msra.mxu1 (!%p968_p6), %v1291_v1  ;;  %v1299_v5 = vld [vmem:[#allocation6] sm:$0xff] (!%p968_p6)   ;;  %v1296_v8 = vld [vmem:[#allocation9 + $0x28] sm:$0xff] (!%p968_p6)  }
  0x69   :  { %121 = vst [vmem:[#allocation2 + $0x30] sm:$0xff] %v1482_v0  ;;  %122 = vst [vmem:[#allocation2 + $0x38] sm:$0xff] %v1482_v0  ;;  %1140 = vmatprep.subr.bf16.mxu0 (!%p968_p6), %v1292_v2  ;;  %1235 = vmatprep.subr.bf16.mxu1 (!%p968_p6), %v1292_v2  ;;  %v1300_v6 = vld [vmem:[#allocation6 + $0x20] sm:$0xff] (!%p968_p6)   ;;  %v1297_v9 = vld [vmem:[#allocation9 + $0x30] sm:$0xff] (!%p968_p6)  }
  0x6a   :  { %123 = vst [vmem:[#allocation2 + $0x40] sm:$0xff] %v1482_v0  ;;  %124 = vst [vmem:[#allocation2 + $0x48] sm:$0xff] %v1482_v0  ;;  %1154 = vmatprep.mubr.bf16.mxu0 (!%p968_p6), %v1299_v5  ;;  %v1295_v7 = vld [vmem:[#allocation9 + $0x20] sm:$0xff] (!%p968_p6)   ;;  %1162 = vmatprep.mubr.bf16.mxu1 (!%p968_p6), %v1300_v6  ;;  %v1298_v10 = vld [vmem:[#allocation9 + $0x38] sm:$0xff] (!%p968_p6)  }
  0x6b   :  { %125 = vst [vmem:[#allocation2 + $0x50] sm:$0xff] %v1482_v0  ;;  %126 = vst [vmem:[#allocation2 + $0x58] sm:$0xff] %v1482_v0  ;;  %v1301_v11 = vld [vmem:[#allocation6 + $0x8] sm:$0xff] (!%p968_p6)   ;;  %v1303_v13 = vld [vmem:[#allocation6 + $0x10] sm:$0xff] (!%p968_p6)  }
  0x6c   :  { %127 = vst [vmem:[#allocation2 + $0x60] sm:$0xff] %v1482_v0  ;;  %128 = vst [vmem:[#allocation2 + $0x68] sm:$0xff] %v1482_v0  ;;  %1141 = vmatpush3.bf16.msra.mxu0 (!%p968_p6), %v1292_v2  ;;  %1243 = vmatpush3.bf16.msra.mxu1 (!%p968_p6), %v1292_v2  ;;  %v1302_v12 = vld [vmem:[#allocation6 + $0x28] sm:$0xff] (!%p968_p6)   ;;  %v1304_v14 = vld [vmem:[#allocation6 + $0x30] sm:$0xff] (!%p968_p6)  }
  0x6d   :  { %129 = vst [vmem:[#allocation2 + $0x70] sm:$0xff] %v1482_v0  ;;  %130 = vst [vmem:[#allocation2 + $0x78] sm:$0xff] %v1482_v0  ;;  %1142 = vmatprep.subr.bf16.mxu0 (!%p968_p6), %v1293_v3  ;;  %1236 = vmatprep.subr.bf16.mxu1 (!%p968_p6), %v1293_v3  ;;  %v1305_v15 = vld [vmem:[#allocation6 + $0x18] sm:$0xff] (!%p968_p6)   ;;  %v136_v19 = vld [vmem:[#allocation2] sm:$0xff] (!%p968_p6) }
  0x6e   :  { %v1306_v16 = vld [vmem:[#allocation6 + $0x38] sm:$0xff]   ;;  %v138_v17 = vld [vmem:[#allocation2 + $0x10] sm:$0xff]  ;;  %v137_v29 = vld [vmem:[#allocation2 + $0x8] sm:$0xff] }
  0x6f   :  { %v139_v23 = vld [vmem:[#allocation2 + $0x18] sm:$0xff]  ;;  %v140_v43 = vld [vmem:[#allocation2 + $0x20] sm:$0xff]  ;;  %v141_v53 = vld [vmem:[#allocation2 + $0x28] sm:$0xff] }
  0x70   :  { %1143 = vmatpush3.bf16.msra.mxu0 %v1293_v3  ;;  %1244 = vmatpush3.bf16.msra.mxu1 %v1293_v3  ;;  %v142_v41 = vld [vmem:[#allocation2 + $0x30] sm:$0xff]  ;;  %v143_v47 = vld [vmem:[#allocation2 + $0x38] sm:$0xff] }
  0x71   :  { %1144 = vmatprep.subr.bf16.mxu0 %v1294_v4  ;;  %1237 = vmatprep.subr.bf16.mxu1 %v1294_v4  ;;  %v144_v20 = vld [vmem:[#allocation2 + $0x40] sm:$0xff]  ;;  %v145_v30 = vld [vmem:[#allocation2 + $0x48] sm:$0xff] }
  0x72   :  { %v146_v18 = vld [vmem:[#allocation2 + $0x50] sm:$0xff]  ;;  %v147_v24 = vld [vmem:[#allocation2 + $0x58] sm:$0xff] }
  0x73   :  { %v148_v44 = vld [vmem:[#allocation2 + $0x60] sm:$0xff]  ;;  %v149_v54 = vld [vmem:[#allocation2 + $0x68] sm:$0xff] }
  0x74   :  { %1145 = vmatpush3.bf16.msra.mxu0 %v1294_v4  ;;  %1245 = vmatpush3.bf16.msra.mxu1 %v1294_v4  ;;  %v150_v42 = vld [vmem:[#allocation2 + $0x70] sm:$0xff]  ;;  %v151_v48 = vld [vmem:[#allocation2 + $0x78] sm:$0xff] }
  0x75   :  { %1146 = vmatprep.subr.bf16.mxu0 %v1295_v7  ;;  %1238 = vmatprep.subr.bf16.mxu1 %v1295_v7 }
  0x78   :  { %1147 = vmatpush3.bf16.msra.mxu0 %v1295_v7  ;;  %1246 = vmatpush3.bf16.msra.mxu1 %v1295_v7 }
  0x79   :  { %1148 = vmatprep.subr.bf16.mxu0 %v1296_v8  ;;  %1239 = vmatprep.subr.bf16.mxu1 %v1296_v8 }
  0x7c   :  { %1149 = vmatpush3.bf16.msra.mxu0 %v1296_v8  ;;  %1247 = vmatpush3.bf16.msra.mxu1 %v1296_v8 }
  0x7d   :  { %1150 = vmatprep.subr.bf16.mxu0 %v1297_v9  ;;  %1240 = vmatprep.subr.bf16.mxu1 %v1297_v9 }
  0x80   :  { %1151 = vmatpush3.bf16.msra.mxu0 %v1297_v9  ;;  %1248 = vmatpush3.bf16.msra.mxu1 %v1297_v9 }
  0x81   :  { %1152 = vmatprep.subr.bf16.mxu0 %v1298_v10  ;;  %1241 = vmatprep.subr.bf16.mxu1 %v1298_v10 }
  0x84   :  { %1153 = vmatpush3.bf16.msra.mxu0 %v1298_v10  ;;  %1249 = vmatpush3.bf16.msra.mxu1 %v1298_v10 }
  0x87   :  { %1155 = vmatmul.mubr.bf16.vlgmr.msra.gmra.mrb[0].mxu0 %v1301_v11  ;;  %1163 = vmatmul.mubr.bf16.vlgmr.msra.gmra.mrb[0].mxu1 %v1302_v12 }
  0x88   :  { %1158 = vmatprep.mubr.bf16.mxu0 %v1303_v13  ;;  %1166 = vmatprep.mubr.bf16.mxu1 %v1304_v14 }
  0x8f   :  { %1159 = vmatmul.mubr.bf16.gmra.mrb[4].mxu0 %v1305_v15  ;;  %1167 = vmatmul.mubr.bf16.gmra.mrb[4].mxu1 %v1306_v16 }
 0x15a   :  { %v1156_v21 = vpop.f32.mrb[0].mxu0  ;;  %v1164_v22 = vpop.f32.mrb[0].mxu1 }
 0x15b   :  { %v379_v25 = vadd.f32 %v1156_v21, %v138_v17  ;;  %v387_v26 = vadd.f32 %v1164_v22, %v146_v18  ;;  %v314_v27 = vpop.f32.mrb[1].mxu0  ;;  %v346_v28 = vpop.f32.mrb[1].mxu1 }
 0x15c   :  { %v377_v31 = vadd.f32 %v314_v27, %v136_v19  ;;  %v385_v32 = vadd.f32 %v346_v28, %v144_v20  ;;  %v1157_v33 = vpop.f32.mrb[2].mxu0  ;;  %v1165_v34 = vpop.f32.mrb[2].mxu1 }
 0x15d   :  { %395 = vst [vmem:[#allocation2 + $0x10] sm:$0xff] %v379_v25  ;;  %403 = vst [vmem:[#allocation2 + $0x50] sm:$0xff] %v387_v26  ;;  %v380_v35 = vadd.f32 %v1157_v33, %v139_v23  ;;  %v388_v36 = vadd.f32 %v1165_v34, %v147_v24  ;;  %v317_v37 = vpop.f32.mrb[3].mxu0  ;;  %v349_v38 = vpop.f32.mrb[3].mxu1 }
 0x15e   :  { %393 = vst [vmem:[#allocation2] sm:$0xff] %v377_v31  ;;  %401 = vst [vmem:[#allocation2 + $0x40] sm:$0xff] %v385_v32  ;;  %v378_v39 = vadd.f32 %v317_v37, %v137_v29  ;;  %v386_v40 = vadd.f32 %v349_v38, %v145_v30 }
 0x15f   :  { %396 = vst [vmem:[#allocation2 + $0x18] sm:$0xff] %v380_v35  ;;  %404 = vst [vmem:[#allocation2 + $0x58] sm:$0xff] %v388_v36 }
 0x160   :  { %394 = vst [vmem:[#allocation2 + $0x8] sm:$0xff] %v378_v39  ;;  %402 = vst [vmem:[#allocation2 + $0x48] sm:$0xff] %v386_v40 }
 0x162   :  { %v1160_v45 = vpop.f32.mrb[4].mxu0  ;;  %v1168_v46 = vpop.f32.mrb[4].mxu1 }
 0x163   :  { %v383_v49 = vadd.f32 %v1160_v45, %v142_v41  ;;  %v391_v50 = vadd.f32 %v1168_v46, %v150_v42  ;;  %v330_v51 = vpop.f32.mrb[5].mxu0  ;;  %v362_v52 = vpop.f32.mrb[5].mxu1 }
 0x164   :  { %v381_v55 = vadd.f32 %v330_v51, %v140_v43  ;;  %v389_v56 = vadd.f32 %v362_v52, %v148_v44  ;;  %v1161_v57 = vpop.f32.mrb[6].mxu0  ;;  %v1169_v58 = vpop.f32.mrb[6].mxu1 }
 0x165   :  { %399 = vst [vmem:[#allocation2 + $0x30] sm:$0xff] %v383_v49  ;;  %407 = vst [vmem:[#allocation2 + $0x70] sm:$0xff] %v391_v50  ;;  %v384_v59 = vadd.f32 %v1161_v57, %v143_v47  ;;  %v392_v60 = vadd.f32 %v1169_v58, %v151_v48  ;;  %v333_v61 = vpop.f32.mrb[7].mxu0  ;;  %v365_v62 = vpop.f32.mrb[7].mxu1 }
 0x166   :  { %397 = vst [vmem:[#allocation2 + $0x20] sm:$0xff] %v381_v55  ;;  %405 = vst [vmem:[#allocation2 + $0x60] sm:$0xff] %v389_v56  ;;  %v382_v63 = vadd.f32 %v333_v61, %v141_v53  ;;  %v390_v0 = vadd.f32 %v365_v62, %v149_v54 }
 0x167   :  { %400 = vst [vmem:[#allocation2 + $0x38] sm:$0xff] %v384_v59  ;;  %408 = vst [vmem:[#allocation2 + $0x78] sm:$0xff] %v392_v60 }
 0x168   :  { %398 = vst [vmem:[#allocation2 + $0x28] sm:$0xff] %v382_v63  ;;  %406 = vst [vmem:[#allocation2 + $0x68] sm:$0xff] %v390_v0 }
 0x169 PF:  { %v1307_v1 = vld [vmem:[#allocation12] sm:$0xff]   ;;  %v1309_v3 = vld [vmem:[#allocation12 + $0x8] sm:$0xff]   ;;  %v1311_v5 = vld [vmem:[#allocation12 + $0x10] sm:$0xff]  }
 0x16a   :  { %v1308_v2 = vld [vmem:[#allocation14] sm:$0xff]   ;;  %1170 = vmatprep.subr.bf16.mxu1 %v1307_v1  ;;  %v1310_v4 = vld [vmem:[#allocation14 + $0x8] sm:$0xff]   ;;  %v1312_v6 = vld [vmem:[#allocation14 + $0x10] sm:$0xff]  }
 0x16b   :  { %1202 = vmatprep.subr.bf16.mxu0 %v1308_v2  ;;  %1171 = vmatpush3.bf16.msra.mxu1 %v1307_v1  ;;  %v1313_v7 = vld [vmem:[#allocation12 + $0x18] sm:$0xff]   ;;  %v1315_v9 = vld [vmem:[#allocation12 + $0x20] sm:$0xff]   ;;  %v1317_v11 = vld [vmem:[#allocation12 + $0x28] sm:$0xff]  }
 0x16c   :  { %1203 = vmatpush3.bf16.msra.mxu0 %v1308_v2  ;;  %1172 = vmatprep.subr.bf16.mxu1 %v1309_v3  ;;  %v1314_v8 = vld [vmem:[#allocation14 + $0x18] sm:$0xff]   ;;  %v1316_v10 = vld [vmem:[#allocation14 + $0x20] sm:$0xff]   ;;  %v413_v13 = vld [vmem:[#allocation2 + $0x8] sm:$0xff] }
 0x16d   :  { %1204 = vmatprep.subr.bf16.mxu0 %v1310_v4  ;;  %v412_v12 = vld [vmem:[#allocation2] sm:$0xff]  ;;  %v1318_v14 = vld [vmem:[#allocation14 + $0x28] sm:$0xff]   ;;  %v1319_v17 = vld [vmem:[#allocation12 + $0x30] sm:$0xff]  }
 0x16e   :  { %v428_v15 = vpack.c.bf16 %v413_v13, %v412_v12  ;;  %v1323_v16 = vld [vmem:[#allocation11] sm:$0xff]   ;;  %v1320_v18 = vld [vmem:[#allocation14 + $0x30] sm:$0xff]   ;;  %v1321_v19 = vld [vmem:[#allocation12 + $0x38] sm:$0xff]  }
 0x16f   :  { %1173 = vmatpush3.bf16.msra.mxu1 %v1309_v3  ;;  %1218 = vmatprep.mubr.bf16.mxu0 %v1323_v16  ;;  %v1322_v20 = vld [vmem:[#allocation14 + $0x38] sm:$0xff]   ;;  %v414_v21 = vld [vmem:[#allocation2 + $0x10] sm:$0xff]  ;;  %v416_v23 = vld [vmem:[#allocation2 + $0x20] sm:$0xff] }
 0x170   :  { %1205 = vmatpush3.bf16.msra.mxu0 %v1310_v4  ;;  %1174 = vmatprep.subr.bf16.mxu1 %v1311_v5  ;;  %v415_v22 = vld [vmem:[#allocation2 + $0x18] sm:$0xff]  ;;  %v417_v24 = vld [vmem:[#allocation2 + $0x28] sm:$0xff]  ;;  %v1325_v28 = vld [vmem:[#allocation11 + $0x10] sm:$0xff]  }
 0x171   :  { %1206 = vmatprep.subr.bf16.mxu0 %v1312_v6  ;;  %1186 = vmatprep.mubr.bf16.mxu1 %v428_v15  ;;  %v429_v25 = vpack.c.bf16 %v415_v22, %v414_v21  ;;  %v1324_v26 = vld [vmem:[#allocation11 + $0x8] sm:$0xff]   ;;  %v430_v27 = vpack.c.bf16 %v417_v24, %v416_v23  ;;  %v418_v29 = vld [vmem:[#allocation2 + $0x30] sm:$0xff]  ;;  %v419_v30 = vld [vmem:[#allocation2 + $0x38] sm:$0xff] }
 0x172   :  { %v420_v31 = vld [vmem:[#allocation2 + $0x40] sm:$0xff]  ;;  %v421_v32 = vld [vmem:[#allocation2 + $0x48] sm:$0xff]  ;;  %v431_v33 = vpack.c.bf16 %v419_v30, %v418_v29  ;;  %v1326_v34 = vld [vmem:[#allocation11 + $0x18] sm:$0xff]  }
 0x173   :  { %1175 = vmatpush3.bf16.msra.mxu1 %v1311_v5  ;;  %v432_v35 = vpack.c.bf16 %v421_v32, %v420_v31  ;;  %v1327_v36 = vld [vmem:[#allocation11 + $0x20] sm:$0xff]   ;;  %v422_v37 = vld [vmem:[#allocation2 + $0x50] sm:$0xff]  ;;  %v423_v38 = vld [vmem:[#allocation2 + $0x58] sm:$0xff] }
 0x174   :  { %1207 = vmatpush3.bf16.msra.mxu0 %v1312_v6  ;;  %1176 = vmatprep.subr.bf16.mxu1 %v1313_v7  ;;  %v424_v39 = vld [vmem:[#allocation2 + $0x60] sm:$0xff]  ;;  %v425_v40 = vld [vmem:[#allocation2 + $0x68] sm:$0xff]  ;;  %v433_v41 = vpack.c.bf16 %v423_v38, %v422_v37  ;;  %v1329_v44 = vld [vmem:[#allocation11 + $0x30] sm:$0xff]  }
 0x175   :  { %1208 = vmatprep.subr.bf16.mxu0 %v1314_v8  ;;  %v1328_v42 = vld [vmem:[#allocation11 + $0x28] sm:$0xff]   ;;  %v434_v43 = vpack.c.bf16 %v425_v40, %v424_v39  ;;  %v426_v45 = vld [vmem:[#allocation2 + $0x70] sm:$0xff]  ;;  %v427_v46 = vld [vmem:[#allocation2 + $0x78] sm:$0xff] }
 0x176   :  { %v435_v47 = vpack.c.bf16 %v427_v46, %v426_v45  ;;  %v1330_v48 = vld [vmem:[#allocation11 + $0x38] sm:$0xff]   ;;  %v1624_v49 = vld [vmem:[%s1663_s6] ss:$0 sm:$0xff]  ;;  %s1483_s6 = smov [#allocation15]  }
 0x177   :  { %1177 = vmatpush3.bf16.msra.mxu1 %v1313_v7  ;;  %s946_s5 = sshll.u32 %s1483_s6, 4  ;;  %s947_s5 = int_to_ptr.vmem [resolvable:$true] %s946_s5 }
 0x178   :  { %1209 = vmatpush3.bf16.msra.mxu0 %v1314_v8  ;;  %1178 = vmatprep.subr.bf16.mxu1 %v1315_v9  ;;  %s1445_s22 = scalar_lea.vmem %s947_s5, 1024  ;;  %p1450_p8 = scmp.lt.s32.totalorder %s947_s5, %s947_s5 }
 0x179   :  { %1210 = vmatprep.subr.bf16.mxu0 %v1316_v10  ;;  %p1446_p7 = scmp.ne.s32.totalorder %s947_s5, %s1445_s22  ;;  %p1451_p9 = scmp.lt.s32.totalorder %s1445_s22, %s1445_s22 }
 0x17b   :  { %1179 = vmatpush3.bf16.msra.mxu1 %v1315_v9  ;;  %p1452_p10 = por %p1451_p9, %p1450_p8 }
 0x17c   :  { %1211 = vmatpush3.bf16.msra.mxu0 %v1316_v10  ;;  %1180 = vmatprep.subr.bf16.mxu1 %v1317_v11 }
 0x17d   :  { %1212 = vmatprep.subr.bf16.mxu0 %v1318_v14  ;;  %p1453_p11 = pnand %p1452_p10, %p1446_p7 }
 0x17f   :  { %1181 = vmatpush3.bf16.msra.mxu1 %v1317_v11 }
 0x180   :  { %1213 = vmatpush3.bf16.msra.mxu0 %v1318_v14  ;;  %1182 = vmatprep.subr.bf16.mxu1 %v1319_v17 }
 0x181   :  { %1214 = vmatprep.subr.bf16.mxu0 %v1320_v18 }
 0x183   :  { %1183 = vmatpush3.bf16.msra.mxu1 %v1319_v17 }
 0x184   :  { %1215 = vmatpush3.bf16.msra.mxu0 %v1320_v18  ;;  %1184 = vmatprep.subr.bf16.mxu1 %v1321_v19 }
 0x185   :  { %1216 = vmatprep.subr.bf16.mxu0 %v1322_v20 }
 0x187   :  { %1185 = vmatpush3.bf16.msra.mxu1 %v1321_v19 }
 0x188   :  { %1217 = vmatpush3.bf16.msra.mxu0 %v1322_v20 }
 0x18a   :  { %1187 = vmatmul.mubr.bf16.vlgmr.msra.gmra.mrb[0].mxu1 %v429_v25 }
 0x18b   :  { %1219 = vmatmul.mubr.bf16.vlgmr.msra.gmra.mrb[0].mxu0 %v1324_v26  ;;  %1190 = vmatprep.mubr.bf16.mxu1 %v430_v27 }
 0x18c   :  { %1222 = vmatprep.mubr.bf16.mxu0 %v1325_v28 }
 0x192   :  { %1191 = vmatmul.mubr.bf16.gmra.mrb[4].mxu1 %v431_v33 }
 0x193   :  { %1223 = vmatmul.mubr.bf16.gmra.mrb[4].mxu0 %v1326_v34  ;;  %1194 = vmatprep.mubr.bf16.mxu1 %v432_v35 }
 0x194   :  { %1226 = vmatprep.mubr.bf16.mxu0 %v1327_v36 }
 0x19a   :  { %1195 = vmatmul.mubr.bf16.gmra.mrb[8].mxu1 %v433_v41 }
 0x19b   :  { %1227 = vmatmul.mubr.bf16.gmra.mrb[8].mxu0 %v1328_v42  ;;  %1198 = vmatprep.mubr.bf16.mxu1 %v434_v43 }
 0x19c   :  { %1230 = vmatprep.mubr.bf16.mxu0 %v1329_v44 }
 0x1a2   :  { %1199 = vmatmul.mubr.bf16.gmra.mrb[12].mxu1 %v435_v47 }
 0x1a3   :  { %1231 = vmatmul.mubr.bf16.gmra.mrb[12].mxu0 %v1330_v48 }
 0x25d   :  { %v1188_v50 = vpop.f32.mrb[0].mxu1 }
 0x25e   :  { %v550_v51 = vadd.f32 %v1188_v50, %v1624_v49  ;;  %v1220_v52 = vpop.f32.mrb[0].mxu0  ;;  %v541_v53 = vpop.f32.mrb[1].mxu1 }
 0x25f   :  { %v542_v54 = vadd.f32 %v1624_v49, %v541_v53  ;;  %v766_v55 = vpop.f32.mrb[1].mxu0  ;;  %v1189_v56 = vpop.f32.mrb[2].mxu1 }
 0x260   :  { %v831_v57 = vadd.f32 %v1220_v52, %v550_v51  ;;  %v553_v58 = vadd.f32 %v1189_v56, %v1624_v49  ;;  %v1221_v59 = vpop.f32.mrb[2].mxu0  ;;  %v544_v60 = vpop.f32.mrb[3].mxu1 }
 0x261   :  { %v829_v61 = vadd.f32 %v766_v55, %v542_v54  ;;  %v545_v62 = vadd.f32 %v1624_v49, %v544_v60  ;;  %v769_v63 = vpop.f32.mrb[3].mxu0 }
 0x262   :  { %v832_v0 = vadd.f32 %v1221_v59, %v553_v58  ;;  %v847_v2 = vmax.f32 %v831_v57, 0.0 }
 0x263   :  { %v830_v1 = vadd.f32 %v769_v63, %v545_v62  ;;  %v845_v4 = vmax.f32 %v829_v61, 0.0 }
 0x264   :  { %v848_v3 = vmax.f32 %v832_v0, 0.0 }
 0x265   :  { %v846_v5 = vmax.f32 %v830_v1, 0.0  ;;  %v1192_v6 = vpop.f32.mrb[4].mxu1 }
 0x266   :  { %v1051_v7 = vpack.c.bf16 %v848_v3, %v847_v2  ;;  %v566_v8 = vadd.f32 %v1192_v6, %v1624_v49  ;;  %v1224_v9 = vpop.f32.mrb[4].mxu0  ;;  %v557_v10 = vpop.f32.mrb[5].mxu1 }
 0x267   :  { %v1046_v11 = vpack.c.bf16 %v846_v5, %v845_v4  ;;  %v558_v12 = vadd.f32 %v1624_v49, %v557_v10  ;;  %v782_v13 = vpop.f32.mrb[5].mxu0  ;;  %v1193_v14 = vpop.f32.mrb[6].mxu1 }
 0x268   :  { %1083 = vst [vmem:[#allocation15 + $0x8] sm:$0xff] %v1051_v7   ;;  %v835_v15 = vadd.f32 %v1224_v9, %v566_v8  ;;  %v569_v16 = vadd.f32 %v1193_v14, %v1624_v49  ;;  %v1225_v17 = vpop.f32.mrb[6].mxu0  ;;  %v560_v18 = vpop.f32.mrb[7].mxu1 }
 0x269   :  { %1047 = vst [vmem:[#allocation15] sm:$0xff] %v1046_v11   ;;  %v833_v19 = vadd.f32 %v782_v13, %v558_v12  ;;  %v561_v20 = vadd.f32 %v1624_v49, %v560_v18  ;;  %v785_v21 = vpop.f32.mrb[7].mxu0 }
 0x26a   :  { %v836_v22 = vadd.f32 %v1225_v17, %v569_v16  ;;  %v851_v24 = vmax.f32 %v835_v15, 0.0 }
 0x26b   :  { %v834_v23 = vadd.f32 %v785_v21, %v561_v20  ;;  %v849_v26 = vmax.f32 %v833_v19, 0.0 }
 0x26c   :  { %v852_v25 = vmax.f32 %v836_v22, 0.0 }
 0x26d   :  { %v850_v27 = vmax.f32 %v834_v23, 0.0  ;;  %v1196_v28 = vpop.f32.mrb[8].mxu1 }
 0x26e   :  { %v1061_v29 = vpack.c.bf16 %v852_v25, %v851_v24  ;;  %v582_v30 = vadd.f32 %v1196_v28, %v1624_v49  ;;  %v1228_v31 = vpop.f32.mrb[8].mxu0  ;;  %v573_v32 = vpop.f32.mrb[9].mxu1 }
 0x26f   :  { %v1056_v33 = vpack.c.bf16 %v850_v27, %v849_v26  ;;  %v574_v34 = vadd.f32 %v1624_v49, %v573_v32  ;;  %v798_v35 = vpop.f32.mrb[9].mxu0  ;;  %v1197_v36 = vpop.f32.mrb[10].mxu1 }
 0x270   :  { %1085 = vst [vmem:[#allocation15 + $0x18] sm:$0xff] %v1061_v29   ;;  %v839_v37 = vadd.f32 %v1228_v31, %v582_v30  ;;  %v585_v38 = vadd.f32 %v1197_v36, %v1624_v49  ;;  %v1229_v39 = vpop.f32.mrb[10].mxu0  ;;  %v576_v40 = vpop.f32.mrb[11].mxu1 }
 0x271   :  { %1084 = vst [vmem:[#allocation15 + $0x10] sm:$0xff] %v1056_v33   ;;  %v837_v41 = vadd.f32 %v798_v35, %v574_v34  ;;  %v577_v42 = vadd.f32 %v1624_v49, %v576_v40  ;;  %v801_v43 = vpop.f32.mrb[11].mxu0 }
 0x272   :  { %v840_v44 = vadd.f32 %v1229_v39, %v585_v38  ;;  %v855_v46 = vmax.f32 %v839_v37, 0.0 }
 0x273   :  { %v838_v45 = vadd.f32 %v801_v43, %v577_v42  ;;  %v853_v48 = vmax.f32 %v837_v41, 0.0 }
 0x274   :  { %v856_v47 = vmax.f32 %v840_v44, 0.0 }
 0x275   :  { %v854_v50 = vmax.f32 %v838_v45, 0.0  ;;  %v1200_v51 = vpop.f32.mrb[12].mxu1 }
 0x276   :  { %v1071_v52 = vpack.c.bf16 %v856_v47, %v855_v46  ;;  %v598_v53 = vadd.f32 %v1200_v51, %v1624_v49  ;;  %v1232_v54 = vpop.f32.mrb[12].mxu0  ;;  %v589_v55 = vpop.f32.mrb[13].mxu1 }
 0x277   :  { %v1066_v56 = vpack.c.bf16 %v854_v50, %v853_v48  ;;  %v590_v57 = vadd.f32 %v1624_v49, %v589_v55  ;;  %v814_v58 = vpop.f32.mrb[13].mxu0  ;;  %v1201_v59 = vpop.f32.mrb[14].mxu1 }
 0x278   :  { %1087 = vst [vmem:[#allocation15 + $0x28] sm:$0xff] %v1071_v52   ;;  %v843_v60 = vadd.f32 %v1232_v54, %v598_v53  ;;  %v601_v61 = vadd.f32 %v1201_v59, %v1624_v49  ;;  %v1233_v62 = vpop.f32.mrb[14].mxu0  ;;  %v592_v63 = vpop.f32.mrb[15].mxu1 }
 0x279   :  { %1086 = vst [vmem:[#allocation15 + $0x20] sm:$0xff] %v1066_v56   ;;  %v841_v0 = vadd.f32 %v814_v58, %v590_v57  ;;  %v593_v1 = vadd.f32 %v1624_v49, %v592_v63  ;;  %v817_v2 = vpop.f32.mrb[15].mxu0 }
 0x27a   :  { %v844_v3 = vadd.f32 %v1233_v62, %v601_v61  ;;  %v859_v5 = vmax.f32 %v843_v60, 0.0 }
 0x27b   :  { %v842_v4 = vadd.f32 %v817_v2, %v593_v1  ;;  %v857_v7 = vmax.f32 %v841_v0, 0.0 }
 0x27c   :  { %v860_v6 = vmax.f32 %v844_v3, 0.0 }
 0x27d   :  { %v858_v8 = vmax.f32 %v842_v4, 0.0 }
 0x27e   :  { %v1081_v9 = vpack.c.bf16 %v860_v6, %v859_v5 }
 0x27f   :  { %v1076_v10 = vpack.c.bf16 %v858_v8, %v857_v7 }
 0x280   :  { %1089 = vst [vmem:[#allocation15 + $0x38] sm:$0xff] %v1081_v9  }
 0x281   :  { %1088 = vst [vmem:[#allocation15 + $0x30] sm:$0xff] %v1076_v10  }
 0x282   :  { %1456 = shalt.err (!%p1453_p11)
}
 0x283   :  { %s1457_s30 = scalar_lea.hbm %s1665_s8, 1024 }
 0x284   :  { %p1458_p12 = scmp.ne.s32.totalorder %s1665_s8, %s1457_s30  ;;  %p1461_p13 = scmp.lt.u32.totalorder %s1457_s30, %s1665_s8 }
 0x286   :  { %p1463_p0 = pnand %p1461_p13, %p1458_p12 }
 0x288   :  { %1466 = shalt.err (!%p1463_p0)
}
 0x289   :  { %952 = dma.vmem_to_hbm [thread:$0]  %s947_s5, 1024, %s1665_s8, [#allocation8], %s1476_s20, %s1476_s20, %s1477_s21  }
 0x28a   :  { %1473 = dma.done.wait [#allocation8], 1024  }
 0x28b   :  { %1474 = vsyncadd [#allocation8], 4294966272 }
 0x28c   :  { %956 = vsyncpa [#allocation7], 1 }
 0x28d   :  { %957 = vsyncpa [#allocation10], 1 }
 0x28e   :  { %958 = vsyncpa [#allocation13], 1 }
 0x28f   :  { %959 = vsyncpa [#allocation8], 1 }

</bundles_post_ra>
